<compile_context>
chip_gen: v5e
topology: v5e:2x2
jax: 0.10.0
libtpu: 0.0.40
codegen_flags: <defaults>
</compile_context>

<pallas_src>
import jax
import jax.numpy as jnp
from jax.experimental import pallas as pl
from jax.experimental.pallas import tpu as pltpu


# --------------------------------------------------------------------------- #
# Phase 1: batched input projection   pre[r] = emb2d[r] @ W_xh   (r = t*B + b) #
# --------------------------------------------------------------------------- #
def _input_proj_kernel(emb_ref, wxh_ref, pre_ref):
    pre_ref[...] = jnp.dot(
        emb_ref[...], wxh_ref[...],
        preferred_element_type=jnp.float32).astype(pre_ref.dtype)


# --------------------------------------------------------------------------- #
# Phase 2: serial recurrence, streamed over grid=(T,), carry in VMEM scratch  #
# --------------------------------------------------------------------------- #
def _recurrence_kernel(pre_ref, whh_ref, vbias_ref, h_all_ref, h_carry):
    # pre_ref / h_all_ref are (1, B, H) blocks streamed along the time axis.
    @pl.when(pl.program_id(0) == 0)
    def _():
        h_carry[...] = jnp.zeros_like(h_carry)

    hh = jnp.dot(h_carry[...], whh_ref[...], preferred_element_type=jnp.float32)
    h_new = jnp.tanh(pre_ref[0].astype(jnp.float32) + vbias_ref[...] + hh)
    h_bf = h_new.astype(h_carry.dtype)      # bf16 carry: every consumer is bf16
    h_carry[...] = h_bf
    h_all_ref[0] = h_bf
    # TODO(synk): hold W_hh resident in the MXU across steps via
    # pltpu.matmul_push_rhs / matmul_acc_lhs / matmul_pop when B << 128.


# --------------------------------------------------------------------------- #
# Phase 3: output projection, vocab-tiled, online LSE into (rt,1) scratch     #
# --------------------------------------------------------------------------- #
def _output_proj_kernel(h_ref, wout_ref, bout_ref, logits_ref, lse_ref,
                        m_ref, l_ref):
    j = pl.program_id(1)

    @pl.when(j == 0)
    def _():
        m_ref[...] = jnp.full_like(m_ref, -jnp.inf)
        l_ref[...] = jnp.zeros_like(l_ref)

    logits = jnp.dot(h_ref[...], wout_ref[...],
                     preferred_element_type=jnp.float32) + bout_ref[...]
    logits_ref[...] = logits          # raw logits; normalized in the epilogue

    m_prev = m_ref[...]
    m_new = jnp.maximum(m_prev, jnp.max(logits, axis=-1, keepdims=True))
    l_ref[...] = (l_ref[...] * jnp.exp(m_prev - m_new)
                  + jnp.sum(jnp.exp(logits - m_new), axis=-1, keepdims=True))
    m_ref[...] = m_new

    @pl.when(j == pl.num_programs(1) - 1)
    def _():
        lse_ref[...] = m_ref[...] + jnp.log(l_ref[...])


# --------------------------------------------------------------------------- #
# Tiling helpers                                                              #
# --------------------------------------------------------------------------- #
def _round_up(x, m):
    return ((x + m - 1) // m) * m


def _row_tile(T, B_p, max_rows=512):
    # Largest tt | T with tt * B_p <= max_rows  ->  row tile rt = tt * B_p.
    # rt is always a multiple of 8 (B_p is) and always divides T * B_p, so no
    # full-extent fallback / unbounded VMEM block is ever needed.
    tt = 1
    for cand in range(1, T + 1):
        if T % cand == 0 and cand * B_p <= max_rows:
            tt = cand
    return tt * B_p


def _vocab_tile(Vp, max_vt=1024):
    for cand in (1024, 512, 256, 128):
        if cand <= max_vt and Vp % cand == 0:
            return cand
    return Vp  # unreachable: Vp is always a multiple of 128


# --------------------------------------------------------------------------- #
# Wrapper                                                                     #
# --------------------------------------------------------------------------- #
def captioning_forward(images, seq, params):
    """images: (B, R, Dv) f32, seq: (B, T) int32 -> (B, T, V) f32 log-probs."""
    W_emb, W_xh, W_hh, W_vh, b_h, W_out, b_out = (
        params["W_emb"], params["W_xh"], params["W_hh"], params["W_vh"],
        params["b_h"], params["W_out"], params["b_out"])
    B, R, Dv = images.shape
    _, T = seq.shape
    V, E = W_emb.shape
    H = W_xh.shape[1]
    f32, bf16 = jnp.float32, jnp.bfloat16

    # ---- cheap glue in XLA (pool / tiny projection / gather / padding) ------
    pooled = jnp.mean(images, axis=1)                       # (B, Dv)
    vbias = (pooled @ W_vh + b_h).astype(f32)               # (B, H)

    # Pad batch to a multiple of 8 sublanes so (B,H) loads/stores are unmasked.
    B_p = _round_up(B, 8)
    if B_p != B:
        seq = jnp.pad(seq, ((0, B_p - B), (0, 0)))
        vbias = jnp.pad(vbias, ((0, B_p - B), (0, 0)))

    # Time-major gather so the big (T*B_p, E) tensor is never transposed.
    # TODO(synk): fuse this gather into Phase 1 (PrefetchScalarGridSpec +
    # pl.Element row gather) to save one HBM round trip of emb2d (best on v5e).
    emb2d = jnp.take(W_emb.astype(bf16), seq.T.reshape(-1), axis=0)  # (T*B_p, E)

    wxh = W_xh.astype(bf16)
    whh = W_hh.astype(bf16)

    # Pad vocab to a multiple of 128 lanes; padded columns get a -1e30 bias so
    # they contribute exactly 0 to the softmax and the final slice drops them.
    Vp = _round_up(V, 128)
    wout_p = jnp.pad(W_out.astype(bf16), ((0, 0), (0, Vp - V)))
    bout_p = jnp.pad(b_out.astype(f32), (0, Vp - V),
                     constant_values=-1e30).reshape(1, Vp)

    rows = T * B_p
    rt = _row_tile(T, B_p)            # row tile for Phases 1 & 3
    vt = _vocab_tile(Vp)              # vocab tile for Phase 3

    # ---- Phase 1: batched input projection (MXU sees rt rows at a time) -----
    pre2d = pl.pallas_call(
        _input_proj_kernel,
        out_shape=jax.ShapeDtypeStruct((rows, H), bf16),
        grid=(rows // rt,),
        in_specs=[
            pl.BlockSpec((rt, E), lambda i: (i, 0)),
            # constant-index weight block.
            # TODO(synk): pipeline_mode=pl.Buffered(1) to halve its residency.
            pl.BlockSpec((E, H), lambda i: (0, 0)),
        ],
        out_specs=pl.BlockSpec((rt, H), lambda i: (i, 0)),
        compiler_params=pltpu.CompilerParams(
            dimension_semantics=("parallel",)),
    )(emb2d, wxh)
    pre_tm = pre2d.reshape(T, B_p, H)       # free reshape: rows are time-major

    # ---- Phase 2: serial recurrence streamed over T ------------------------
    # TODO(synk): on v7x, split B_p across the two TensorCores with a leading
    # "parallel" grid axis (each half keeps its own carry scratch).
    h_all = pl.pallas_call(
        _recurrence_kernel,
        out_shape=jax.ShapeDtypeStruct((T, B_p, H), bf16),
        grid=(T,),
        in_specs=[
            pl.BlockSpec((1, B_p, H), lambda t: (t, 0, 0)),
            pl.BlockSpec((H, H), lambda t: (0, 0)),     # resident weight
            pl.BlockSpec((B_p, H), lambda t: (0, 0)),   # resident vbias
        ],
        out_specs=pl.BlockSpec((1, B_p, H), lambda t: (t, 0, 0)),
        scratch_shapes=[pltpu.VMEM((B_p, H), bf16)],    # hidden-state carry
        compiler_params=pltpu.CompilerParams(
            dimension_semantics=("arbitrary",)),
    )(pre_tm, whh, vbias)

    # ---- Phase 3: output projection (vocab tiled) + online LSE -------------
    h2d = h_all.reshape(rows, H)
    logits2d, lse = pl.pallas_call(
        _output_proj_kernel,
        out_shape=(jax.ShapeDtypeStruct((rows, Vp), f32),
                   jax.ShapeDtypeStruct((rows, 1), f32)),
        grid=(rows // rt, Vp // vt),
        in_specs=[
            pl.BlockSpec((rt, H), lambda i, j: (i, 0)),
            pl.BlockSpec((H, vt), lambda i, j: (0, j)),
            pl.BlockSpec((1, vt), lambda i, j: (0, j)),
        ],
        out_specs=[pl.BlockSpec((rt, vt), lambda i, j: (i, j)),
                   pl.BlockSpec((rt, 1), lambda i, j: (i, 0))],
        scratch_shapes=[pltpu.VMEM((rt, 1), f32),       # running max
                        pltpu.VMEM((rt, 1), f32)],      # running sum-exp
        compiler_params=pltpu.CompilerParams(
            dimension_semantics=("parallel", "arbitrary")),
    )(h2d, wout_p, bout_p)

    # Epilogue (fused by XLA): normalize, drop vocab/batch padding, transpose.
    # TODO(synk): for v5e, emit bf16 logits or fuse the downstream NLL gather
    # to shrink the dominant (rows, Vp) f32 writeback.
    logp = (logits2d[:, :V] - lse).reshape(T, B_p, V)[:, :B]
    return jnp.transpose(logp, (1, 0, 2))                # (B, T, V)


# --------------------------------------------------------------------------- #
# Pure-JAX reference (mirrors the kernel's bf16-in / f32-accumulate casts)    #
# --------------------------------------------------------------------------- #
def captioning_forward_ref(images, seq, params):
    W_emb, W_xh, W_hh, W_vh, b_h, W_out, b_out = (
        params["W_emb"], params["W_xh"], params["W_hh"], params["W_vh"],
        params["b_h"], params["W_out"], params["b_out"])
    B, T = seq.shape
    H = W_xh.shape[1]
    f32, bf16 = jnp.float32, jnp.bfloat16

    pooled = jnp.mean(images, axis=1)
    vbias = (pooled @ W_vh + b_h).astype(f32)            # (B, H)
    emb = W_emb[seq].astype(bf16)                        # (B, T, E)
    wxh, whh, wout = W_xh.astype(bf16), W_hh.astype(bf16), W_out.astype(bf16)

    h = jnp.zeros((B, H), bf16)                          # bf16 carry (as kernel)
    outs = []
    for t in range(T):
        pre = jnp.dot(emb[:, t], wxh,
                      preferred_element_type=jnp.float32).astype(bf16)
        h = jnp.tanh(pre.astype(f32) + vbias +
                     jnp.dot(h, whh, preferred_element_type=jnp.float32)
                     ).astype(bf16)
        logits = jnp.dot(h, wout, preferred_element_type=jnp.float32) + b_out
        outs.append(jax.nn.log_softmax(logits, axis=-1))
    return jnp.stack(outs, axis=1)


# --------------------------------------------------------------------------- #
# main                                                                        #
# --------------------------------------------------------------------------- #
if __name__ == "__main__":
    B, T, R, Dv, E, H, V = 2, 8, 8, 32, 32, 32, 64

    key = jax.random.PRNGKey(0)
    ks = jax.random.split(key, 9)
    params = {
        "W_emb": jax.random.normal(ks[0], (V, E), jnp.float32) * 0.1,
        "W_xh":  jax.random.normal(ks[1], (E, H), jnp.float32) * 0.1,
        "W_hh":  jax.random.normal(ks[2], (H, H), jnp.float32) * 0.1,
        "W_vh":  jax.random.normal(ks[3], (Dv, H), jnp.float32) * 0.1,
        "b_h":   jax.random.normal(ks[4], (H,), jnp.float32) * 0.01,
        "W_out": jax.random.normal(ks[5], (H, V), jnp.float32) * 0.1,
        "b_out": jax.random.normal(ks[6], (V,), jnp.float32) * 0.01,
    }
    images = jax.random.normal(ks[7], (B, R, Dv), jnp.float32)
    seq = jax.random.randint(ks[8], (B, T), 0, V, jnp.int32)

    fwd = jax.jit(captioning_forward)
    out = fwd(images, seq, params)
    out = jax.block_until_ready(out)

    ref = captioning_forward_ref(images, seq, params)
    assert out.shape == (B, T, V)
    assert jnp.allclose(out, ref, atol=5e-3, rtol=5e-3), "mismatch vs reference"

    print("KERNEL_OK")
</pallas_src>

<mosaic_0001>
module attributes {stable_mosaic.version = 11 : i64} {
  func.func @_input_proj_kernel(%arg0: i32, %arg1: memref<64x32xbf16, #tpu.memory_space<vmem>>, %arg2: memref<32x32xbf16, #tpu.memory_space<vmem>>, %arg3: memref<64x32xbf16, #tpu.memory_space<vmem>>) attributes {dimension_semantics = [#tpu.dimension_semantics<parallel>], iteration_bounds = array<i64: 1>, scalar_prefetch = 0 : i64, scratch_operands = 0 : i64, tpu.core_type = #tpu.core_type<tc>, window_params = [{transform_indices = @transform_0, window_bounds = array<i64: 64, 32>}, {pipeline_mode = #tpu.pipeline_mode<synchronous>, transform_indices = @transform_1, window_bounds = array<i64: 32, 32>}, {transform_indices = @transform_2, window_bounds = array<i64: 64, 32>}]} {
    %c0 = arith.constant 0 : index
    %c0_0 = arith.constant 0 : index
    %0 = vector.load %arg1[%c0, %c0_0] : memref<64x32xbf16, #tpu.memory_space<vmem>>, vector<64x32xbf16>
    %c0_1 = arith.constant 0 : index
    %c0_2 = arith.constant 0 : index
    %1 = vector.load %arg2[%c0_1, %c0_2] : memref<32x32xbf16, #tpu.memory_space<vmem>>, vector<32x32xbf16>
    %cst = arith.constant dense<0.000000e+00> : vector<64x32xf32>
    %2 = tpu.matmul %0, %1, %cst {dimension_numbers = #tpu.dot_dimension_numbers<[1], [0], [0], [1], [0, 0, 1, 1], [], []>} : vector<64x32xbf16>, vector<32x32xbf16>, vector<64x32xf32> -> vector<64x32xf32>
    %3 = arith.truncf %2 : vector<64x32xf32> to vector<64x32xbf16>
    %c0_3 = arith.constant 0 : index
    %c0_4 = arith.constant 0 : index
    %4 = vector.load %arg3[%c0_3, %c0_4] : memref<64x32xbf16, #tpu.memory_space<vmem>>, vector<64x32xbf16>
    tpu.vector_store %arg3[%c0_3, %c0_4], %3 {strides = array<i32>} : memref<64x32xbf16, #tpu.memory_space<vmem>>, vector<64x32xbf16>,
    return
  }
  func.func @transform_0(%arg0: i32) -> (i32, i32) {
    %c0_i32 = arith.constant 0 : i32
    %c0_i32_0 = arith.constant 0 : i32
    return %arg0, %c0_i32 : i32, i32
  }
  func.func @transform_1(%arg0: i32) -> (i32, i32) {
    %c0_i32 = arith.constant 0 : i32
    %c0_i32_0 = arith.constant 0 : i32
    %c0_i32_1 = arith.constant 0 : i32
    return %c0_i32, %c0_i32_0 : i32, i32
  }
  func.func @transform_2(%arg0: i32) -> (i32, i32) {
    %c0_i32 = arith.constant 0 : i32
    %c0_i32_0 = arith.constant 0 : i32
    return %arg0, %c0_i32 : i32, i32
  }
}

module attributes {stable_mosaic.version = 11 : i64} {
  func.func @_output_proj_kernel(%arg0: i32, %arg1: i32, %arg2: memref<64x32xbf16, #tpu.memory_space<vmem>>, %arg3: memref<32x128xbf16, #tpu.memory_space<vmem>>, %arg4: memref<1x128xf32, #tpu.memory_space<vmem>>, %arg5: memref<64x128xf32, #tpu.memory_space<vmem>>, %arg6: memref<64x1xf32, #tpu.memory_space<vmem>>, %arg7: memref<64x1xf32, #tpu.memory_space<vmem>>, %arg8: memref<64x1xf32, #tpu.memory_space<vmem>>) attributes {dimension_semantics = [#tpu.dimension_semantics<parallel>, #tpu.dimension_semantics<arbitrary>], iteration_bounds = array<i64: 1, 1>, scalar_prefetch = 0 : i64, scratch_operands = 2 : i64, tpu.core_type = #tpu.core_type<tc>, window_params = [{transform_indices = @transform_0, window_bounds = array<i64: 64, 32>}, {transform_indices = @transform_1, window_bounds = array<i64: 32, 128>}, {transform_indices = @transform_2, window_bounds = array<i64: 1, 128>}, {transform_indices = @transform_3, window_bounds = array<i64: 64, 128>}, {transform_indices = @transform_4, window_bounds = array<i64: 64, 1>}]} {
    %c0_i32 = arith.constant 0 : i32
    %0 = arith.cmpi eq, %arg1, %c0_i32 : i32
    %1 = arith.extui %0 : i1 to i32
    %c0_i32_0 = arith.constant 0 : i32
    %2 = arith.cmpi ne, %1, %c0_i32_0 : i32
    scf.if %2 {
      %cst_20 = arith.constant 0xFF800000 : f32
      %29 = vector.broadcast %cst_20 : f32 to vector<64x1xf32>
      %c0_21 = arith.constant 0 : index
      %c0_22 = arith.constant 0 : index
      %30 = vector.load %arg7[%c0_21, %c0_22] : memref<64x1xf32, #tpu.memory_space<vmem>>, vector<64x1xf32>
      tpu.vector_store %arg7[%c0_21, %c0_22], %29 {strides = array<i32>} : memref<64x1xf32, #tpu.memory_space<vmem>>, vector<64x1xf32>,
      %cst_23 = arith.constant 0.000000e+00 : f32
      %31 = vector.broadcast %cst_23 : f32 to vector<64x1xf32>
      %c0_24 = arith.constant 0 : index
      %c0_25 = arith.constant 0 : index
      %32 = vector.load %arg8[%c0_24, %c0_25] : memref<64x1xf32, #tpu.memory_space<vmem>>, vector<64x1xf32>
      tpu.vector_store %arg8[%c0_24, %c0_25], %31 {strides = array<i32>} : memref<64x1xf32, #tpu.memory_space<vmem>>, vector<64x1xf32>,
    } else {
    }
    %c0 = arith.constant 0 : index
    %c0_1 = arith.constant 0 : index
    %3 = vector.load %arg2[%c0, %c0_1] : memref<64x32xbf16, #tpu.memory_space<vmem>>, vector<64x32xbf16>
    %c0_2 = arith.constant 0 : index
    %c0_3 = arith.constant 0 : index
    %4 = vector.load %arg3[%c0_2, %c0_3] : memref<32x128xbf16, #tpu.memory_space<vmem>>, vector<32x128xbf16>
    %cst = arith.constant dense<0.000000e+00> : vector<64x128xf32>
    %5 = tpu.matmul %3, %4, %cst {dimension_numbers = #tpu.dot_dimension_numbers<[1], [0], [0], [1], [0, 0, 1, 1], [], []>} : vector<64x32xbf16>, vector<32x128xbf16>, vector<64x128xf32> -> vector<64x128xf32>
    %c0_4 = arith.constant 0 : index
    %c0_5 = arith.constant 0 : index
    %6 = vector.load %arg4[%c0_4, %c0_5] : memref<1x128xf32, #tpu.memory_space<vmem>>, vector<1x128xf32>
    %7 = vector.broadcast %6 : vector<1x128xf32> to vector<64x128xf32>
    %8 = arith.addf %5, %7 : vector<64x128xf32>
    %c0_6 = arith.constant 0 : index
    %c0_7 = arith.constant 0 : index
    %9 = vector.load %arg5[%c0_6, %c0_7] : memref<64x128xf32, #tpu.memory_space<vmem>>, vector<64x128xf32>
    tpu.vector_store %arg5[%c0_6, %c0_7], %8 {strides = array<i32>} : memref<64x128xf32, #tpu.memory_space<vmem>>, vector<64x128xf32>,
    %c0_8 = arith.constant 0 : index
    %c0_9 = arith.constant 0 : index
    %10 = vector.load %arg7[%c0_8, %c0_9] : memref<64x1xf32, #tpu.memory_space<vmem>>, vector<64x1xf32>
    %cst_10 = arith.constant dense<0xFF800000> : vector<64xf32>
    %11 = vector.multi_reduction <maximumf>, %8, %cst_10 [1] : vector<64x128xf32> to vector<64xf32>
    %12 = vector.shape_cast %11 : vector<64xf32> to vector<64x1xf32>
    %13 = arith.maximumf %10, %12 : vector<64x1xf32>
    %c0_11 = arith.constant 0 : index
    %c0_12 = arith.constant 0 : index
    %14 = vector.load %arg8[%c0_11, %c0_12] : memref<64x1xf32, #tpu.memory_space<vmem>>, vector<64x1xf32>
    %15 = arith.subf %10, %13 : vector<64x1xf32>
    %16 = math.exp %15 : vector<64x1xf32>
    %17 = arith.mulf %14, %16 : vector<64x1xf32>
    %18 = vector.broadcast %13 : vector<64x1xf32> to vector<64x128xf32>
    %19 = arith.subf %8, %18 : vector<64x128xf32>
    %20 = math.exp %19 : vector<64x128xf32>
    %cst_13 = arith.constant dense<0.000000e+00> : vector<64xf32>
    %21 = vector.multi_reduction <add>, %20, %cst_13 [1] : vector<64x128xf32> to vector<64xf32>
    %22 = vector.shape_cast %21 : vector<64xf32> to vector<64x1xf32>
    %23 = arith.addf %17, %22 : vector<64x1xf32>
    %c0_14 = arith.constant 0 : index
    %c0_15 = arith.constant 0 : index
    %24 = vector.load %arg8[%c0_14, %c0_15] : memref<64x1xf32, #tpu.memory_space<vmem>>, vector<64x1xf32>
    tpu.vector_store %arg8[%c0_14, %c0_15], %23 {strides = array<i32>} : memref<64x1xf32, #tpu.memory_space<vmem>>, vector<64x1xf32>,
    %c0_16 = arith.constant 0 : index
    %c0_17 = arith.constant 0 : index
    %25 = vector.load %arg7[%c0_16, %c0_17] : memref<64x1xf32, #tpu.memory_space<vmem>>, vector<64x1xf32>
    tpu.vector_store %arg7[%c0_16, %c0_17], %13 {strides = array<i32>} : memref<64x1xf32, #tpu.memory_space<vmem>>, vector<64x1xf32>,
    %c0_i32_18 = arith.constant 0 : i32
    %26 = arith.cmpi eq, %arg1, %c0_i32_18 : i32
    %27 = arith.extui %26 : i1 to i32
    %c0_i32_19 = arith.constant 0 : i32
    %28 = arith.cmpi ne, %27, %c0_i32_19 : i32
    scf.if %28 {
      %c0_20 = arith.constant 0 : index
      %c0_21 = arith.constant 0 : index
      %29 = vector.load %arg7[%c0_20, %c0_21] : memref<64x1xf32, #tpu.memory_space<vmem>>, vector<64x1xf32>
      %c0_22 = arith.constant 0 : index
      %c0_23 = arith.constant 0 : index
      %30 = vector.load %arg8[%c0_22, %c0_23] : memref<64x1xf32, #tpu.memory_space<vmem>>, vector<64x1xf32>
      %31 = math.log %30 : vector<64x1xf32>
      %32 = arith.addf %29, %31 : vector<64x1xf32>
      %c0_24 = arith.constant 0 : index
      %c0_25 = arith.constant 0 : index
      %33 = vector.load %arg6[%c0_24, %c0_25] : memref<64x1xf32, #tpu.memory_space<vmem>>, vector<64x1xf32>
      tpu.vector_store %arg6[%c0_24, %c0_25], %32 {strides = array<i32>} : memref<64x1xf32, #tpu.memory_space<vmem>>, vector<64x1xf32>,
    } else {
    }
    return
  }
  func.func @transform_0(%arg0: i32, %arg1: i32) -> (i32, i32) {
    %c0_i32 = arith.constant 0 : i32
    %c0_i32_0 = arith.constant 0 : i32
    return %arg0, %c0_i32 : i32, i32
  }
  func.func @transform_1(%arg0: i32, %arg1: i32) -> (i32, i32) {
    %c0_i32 = arith.constant 0 : i32
    %c0_i32_0 = arith.constant 0 : i32
    return %c0_i32, %arg1 : i32, i32
  }
  func.func @transform_2(%arg0: i32, %arg1: i32) -> (i32, i32) {
    %c0_i32 = arith.constant 0 : i32
    %c0_i32_0 = arith.constant 0 : i32
    return %c0_i32, %arg1 : i32, i32
  }
  func.func @transform_3(%arg0: i32, %arg1: i32) -> (i32, i32) {
    %c0_i32 = arith.constant 0 : i32
    return %arg0, %arg1 : i32, i32
  }
  func.func @transform_4(%arg0: i32, %arg1: i32) -> (i32, i32) {
    %c0_i32 = arith.constant 0 : i32
    %c0_i32_0 = arith.constant 0 : i32
    return %arg0, %c0_i32 : i32, i32
  }
}

module attributes {stable_mosaic.version = 11 : i64} {
  func.func @_recurrence_kernel(%arg0: i32, %arg1: memref<1x8x32xbf16, #tpu.memory_space<vmem>>, %arg2: memref<32x32xbf16, #tpu.memory_space<vmem>>, %arg3: memref<8x32xf32, #tpu.memory_space<vmem>>, %arg4: memref<1x8x32xbf16, #tpu.memory_space<vmem>>, %arg5: memref<8x32xbf16, #tpu.memory_space<vmem>>) attributes {dimension_semantics = [#tpu.dimension_semantics<arbitrary>], iteration_bounds = array<i64: 8>, scalar_prefetch = 0 : i64, scratch_operands = 1 : i64, tpu.core_type = #tpu.core_type<tc>, window_params = [{transform_indices = @transform_0, window_bounds = array<i64: 1, 8, 32>}, {pipeline_mode = #tpu.pipeline_mode<synchronous>, transform_indices = @transform_1, window_bounds = array<i64: 32, 32>}, {pipeline_mode = #tpu.pipeline_mode<synchronous>, transform_indices = @transform_2, window_bounds = array<i64: 8, 32>}, {transform_indices = @transform_3, window_bounds = array<i64: 1, 8, 32>}]} {
    %c0_i32 = arith.constant 0 : i32
    %0 = arith.cmpi eq, %arg0, %c0_i32 : i32
    %1 = arith.extui %0 : i1 to i32
    %c0_i32_0 = arith.constant 0 : i32
    %2 = arith.cmpi ne, %1, %c0_i32_0 : i32
    scf.if %2 {
      %cst_14 = arith.constant 0.000000e+00 : bf16
      %18 = vector.broadcast %cst_14 : bf16 to vector<8x32xbf16>
      %c0_15 = arith.constant 0 : index
      %c0_16 = arith.constant 0 : index
      %19 = vector.load %arg5[%c0_15, %c0_16] : memref<8x32xbf16, #tpu.memory_space<vmem>>, vector<8x32xbf16>
      tpu.vector_store %arg5[%c0_15, %c0_16], %18 {strides = array<i32>} : memref<8x32xbf16, #tpu.memory_space<vmem>>, vector<8x32xbf16>,
    } else {
    }
    %c0 = arith.constant 0 : index
    %c0_1 = arith.constant 0 : index
    %3 = vector.load %arg5[%c0, %c0_1] : memref<8x32xbf16, #tpu.memory_space<vmem>>, vector<8x32xbf16>
    %c0_2 = arith.constant 0 : index
    %c0_3 = arith.constant 0 : index
    %4 = vector.load %arg2[%c0_2, %c0_3] : memref<32x32xbf16, #tpu.memory_space<vmem>>, vector<32x32xbf16>
    %cst = arith.constant dense<0.000000e+00> : vector<8x32xf32>
    %5 = tpu.matmul %3, %4, %cst {dimension_numbers = #tpu.dot_dimension_numbers<[1], [0], [0], [1], [0, 0, 1, 1], [], []>} : vector<8x32xbf16>, vector<32x32xbf16>, vector<8x32xf32> -> vector<8x32xf32>
    %c0_4 = arith.constant 0 : index
    %c0_5 = arith.constant 0 : index
    %c0_6 = arith.constant 0 : index
    %6 = vector.load %arg1[%c0_4, %c0_5, %c0_6] : memref<1x8x32xbf16, #tpu.memory_space<vmem>>, vector<1x8x32xbf16>
    %7 = vector.shape_cast %6 : vector<1x8x32xbf16> to vector<8x32xbf16>
    %8 = arith.extf %7 : vector<8x32xbf16> to vector<8x32xf32>
    %c0_7 = arith.constant 0 : index
    %c0_8 = arith.constant 0 : index
    %9 = vector.load %arg3[%c0_7, %c0_8] : memref<8x32xf32, #tpu.memory_space<vmem>>, vector<8x32xf32>
    %10 = arith.addf %8, %9 : vector<8x32xf32>
    %11 = arith.addf %10, %5 : vector<8x32xf32>
    %12 = math.tanh %11 : vector<8x32xf32>
    %13 = arith.truncf %12 : vector<8x32xf32> to vector<8x32xbf16>
    %c0_9 = arith.constant 0 : index
    %c0_10 = arith.constant 0 : index
    %14 = vector.load %arg5[%c0_9, %c0_10] : memref<8x32xbf16, #tpu.memory_space<vmem>>, vector<8x32xbf16>
    tpu.vector_store %arg5[%c0_9, %c0_10], %13 {strides = array<i32>} : memref<8x32xbf16, #tpu.memory_space<vmem>>, vector<8x32xbf16>,
    %c0_11 = arith.constant 0 : index
    %c0_12 = arith.constant 0 : index
    %c0_13 = arith.constant 0 : index
    %15 = vector.load %arg4[%c0_11, %c0_12, %c0_13] : memref<1x8x32xbf16, #tpu.memory_space<vmem>>, vector<1x8x32xbf16>
    %16 = vector.shape_cast %15 : vector<1x8x32xbf16> to vector<8x32xbf16>
    %17 = vector.shape_cast %13 : vector<8x32xbf16> to vector<1x8x32xbf16>
    tpu.vector_store %arg4[%c0_11, %c0_12, %c0_13], %17 {strides = array<i32>} : memref<1x8x32xbf16, #tpu.memory_space<vmem>>, vector<1x8x32xbf16>,
    return
  }
  func.func @transform_0(%arg0: i32) -> (i32, i32, i32) {
    %c0_i32 = arith.constant 0 : i32
    %c0_i32_0 = arith.constant 0 : i32
    %c0_i32_1 = arith.constant 0 : i32
    return %arg0, %c0_i32, %c0_i32_0 : i32, i32, i32
  }
  func.func @transform_1(%arg0: i32) -> (i32, i32) {
    %c0_i32 = arith.constant 0 : i32
    %c0_i32_0 = arith.constant 0 : i32
    %c0_i32_1 = arith.constant 0 : i32
    return %c0_i32, %c0_i32_0 : i32, i32
  }
  func.func @transform_2(%arg0: i32) -> (i32, i32) {
    %c0_i32 = arith.constant 0 : i32
    %c0_i32_0 = arith.constant 0 : i32
    %c0_i32_1 = arith.constant 0 : i32
    return %c0_i32, %c0_i32_0 : i32, i32
  }
  func.func @transform_3(%arg0: i32) -> (i32, i32, i32) {
    %c0_i32 = arith.constant 0 : i32
    %c0_i32_0 = arith.constant 0 : i32
    %c0_i32_1 = arith.constant 0 : i32
    return %arg0, %c0_i32, %c0_i32_0 : i32, i32, i32
  }
}

</mosaic_0001>

<bundles_post_ra>
// kernel: captioning_forward.3
= control target key start
LH: loop header
LB: loop body
LE: loop exit
PB: predicated region body
PF: predicated region fallthrough
CT: control target
= control target key end

     0   :  { %vm56_vm0 = vcmask 261120   ;;  %vm106_vm1 = vcmask 257024   ;;  %s224_s1 = inlined_call_operand.vmem [shape: bf16[32,32], index: 1, kind: input, shape index: {}]   ;;  %s225_s0 = inlined_call_operand.vmem [shape: bf16[64,32], index: 0, kind: input, shape index: {}]   ;;  %s226_s2 = inlined_call_operand.vmem [shape: bf16[64,32], index: 2, kind: output, shape index: {}]  }
   0x1   :  { %v152_v0 = vld [vmem:[%s224_s1 + $0x8] sm:$0xff]  ;;  %v151_v1 = vld [vmem:[%s224_s1] sm:$0xff]  ;;  %v149_v4 = vld [vmem:[%s225_s0 + $0x10] sm:$0xff] }
   0x2   :  { %75 = vmatpush.bf16.msra.mxu0 %v152_v0  ;;  %153 = vmatpush.bf16.msra.mxu1 %v152_v0  ;;  %v147_v2 = vld [vmem:[%s225_s0] sm:$0xff]  ;;  %v148_v3 = vld [vmem:[%s225_s0 + $0x8] sm:$0xff]  ;;  %v150_v5 = vld [vmem:[%s225_s0 + $0x18] sm:$0xff] }
   0x3   :  { %154 = vmatpush.bf16.msra.mxu2 %v152_v0  ;;  %155 = vmatpush.bf16.msra.mxu3 %v152_v0 }
   0x6   :  { %76 = vmatpush.bf16.msra.mxu0 %v151_v1  ;;  %156 = vmatpush.bf16.msra.mxu1 %v151_v1 }
   0x7   :  { %157 = vmatpush.bf16.msra.mxu2 %v151_v1  ;;  %158 = vmatpush.bf16.msra.mxu3 %v151_v1 }
   0x9   :  { %143 = vmatmul.msk.bf16.vlgmr.msra.gmra.mxu0 %vm56_vm0, %v147_v2  ;;  %144 = vmatmul.msk.bf16.vlgmr.msra.gmra.mxu1 %vm56_vm0, %v148_v3 }
   0xa   :  { %145 = vmatmul.msk.bf16.vlgmr.msra.gmra.mxu2 %vm56_vm0, %v149_v4  ;;  %146 = vmatmul.msk.bf16.vlgmr.msra.gmra.mxu3 %vm56_vm0, %v150_v5 }
  0x86   :  { %v78_v6 = vpop.f32.mrf.mxu0  ;;  %v83_v7 = vpop.f32.mrf.mxu1 }
  0x87   :  { %v98_v8 = vpack.c.bf16 %v78_v6, %v78_v6  ;;  %v100_v9 = vpack.c.bf16 %v83_v7, %v83_v7 }
  0x89   :  { %107 = vst.msk [vmem:[%s226_s2] sm:$0xf] %vm106_vm1, %v98_v8 }
  0x8a   :  { %109 = vst.msk [vmem:[%s226_s2 + $0x8] sm:$0xf] %vm106_vm1, %v100_v9 }
  0x8d   :  { %v88_v10 = vpop.f32.mrf.mxu2  ;;  %v93_v11 = vpop.f32.mrf.mxu3 }
  0x8e   :  { %v102_v12 = vpack.c.bf16 %v88_v10, %v88_v10  ;;  %v104_v13 = vpack.c.bf16 %v93_v11, %v93_v11  ;;  %v80_v14 = vpop.f32.mrf.mxu0  ;;  %v85_v15 = vpop.f32.mrf.mxu1 }
  0x8f   :  { %v99_v16 = vpack.c.bf16 %v80_v14, %v80_v14  ;;  %v101_v17 = vpack.c.bf16 %v85_v15, %v85_v15 }
  0x90   :  { %111 = vst.msk [vmem:[%s226_s2 + $0x10] sm:$0xf] %vm106_vm1, %v102_v12 }
  0x91   :  { %113 = vst.msk [vmem:[%s226_s2 + $0x18] sm:$0xf] %vm106_vm1, %v104_v13 }
  0x92   :  { %108 = vst.msk [vmem:[%s226_s2 + $0x4] sm:$0xf] %vm106_vm1, %v99_v16 }
  0x93   :  { %110 = vst.msk [vmem:[%s226_s2 + $0xc] sm:$0xf] %vm106_vm1, %v101_v17 }
  0x95   :  { %v90_v18 = vpop.f32.mrf.mxu2  ;;  %v95_v19 = vpop.f32.mrf.mxu3 }
  0x96   :  { %v103_v20 = vpack.c.bf16 %v90_v18, %v90_v18  ;;  %v105_v21 = vpack.c.bf16 %v95_v19, %v95_v19 }
  0x98   :  { %112 = vst.msk [vmem:[%s226_s2 + $0x14] sm:$0xf] %vm106_vm1, %v103_v20 }
  0x99   :  { %114 = vst.msk [vmem:[%s226_s2 + $0x1c] sm:$0xf] %vm106_vm1, %v105_v21 }

// kernel: captioning_forward.4
= control target key start
LH: loop header
LB: loop body
LE: loop exit
PB: predicated region body
PF: predicated region fallthrough
CT: control target
= control target key end

     0   :  { %s331_s12 = smov 0   ;;  %s357_s0 = inlined_call_operand.vmem [shape: bf16[8,8,32], index: 0, kind: input, shape index: {}]   ;;  %s358_s1 = inlined_call_operand.vmem [shape: bf16[32,32], index: 1, kind: input, shape index: {}]   ;;  %s359_s2 = inlined_call_operand.vmem [shape: f32[8,32], index: 2, kind: input, shape index: {}]   ;;  %s360_s3 = inlined_call_operand.vmem [shape: bf16[8,8,32], index: 3, kind: output, shape index: {}]  }
   0x1 LB: > { %s270_s13 = sadd.s32 4294967295, %s308_s12   ;;  %p274_p0 = scmp.ge.s32.totalorder %s308_s12, 1  ;;  %s308_s12 = sphi %s331_s12, %s13_s12  }
   0x2   : > { %p136_p1 = scmp.lt.s32.totalorder %s308_s12, 9 }
   0x4   : > { %p137_p2 = pnand %p274_p0, %p136_p1 }
   0x5   : > { %p158_p3 = scmp.lt.s32.totalorder (!%p137_p2), %s270_s13, 7  ;;  %p277_p4 = scmp.ne.s32.totalorder (!%p137_p2), %s270_s13, 0 }
   0x6   : > { %140 = sbr.rel (%p137_p2) target bundleno = 166 (0xa6), region = 32 }
   0xb   : > { %s159_s14 = scalar_select %p158_p3, %s270_s13, 7 }
   0xc   : > { %170 = sbr.rel (%p277_p4) target bundleno = 19 (0x13), region = 36 }
   0xd   : > { %s275_s15 = sshll.u32 %s159_s14, 2 }
   0xe   : > { %s161_s18 = scalar_lea.vmem %s357_s0, %s275_s15  ;;  %s165_s21 = scalar_lea.vmem %s360_s3, %s275_s15 }
  0x11   : > { %vm171_vm0 = vcmask 257024   ;;  %v310_v0 = vmov 0  }
  0x12   : > { %172 = vst.msk [vmem:[#allocation2] sm:$0xf] %vm171_vm0, %v310_v0 }
  0x13 PF: > { %v290_v1 = vld [vmem:[%s358_s1 + $0x8] sm:$0xff]  ;;  %v289_v2 = vld [vmem:[%s358_s1] sm:$0xff]  ;;  %vm190_vm1 = vcmask 261120   ;;  %vm214_vm2 = vcmask 257024  }
  0x14   : > { %200 = vmatpush.bf16.msra.mxu0 %v290_v1  ;;  %v207_v4 = vld [vmem:[%s161_s18] sm:$0xf] }
  0x15   : > { %v208_v5 = vunpack.c.l.bf16 %v207_v4  ;;  %v209_v6 = vld [vmem:[%s359_s2] sm:$0xff] }
  0x17   : > { %v210_v7 = vadd.f32 %v209_v6, %v208_v5 }
  0x18   : > { %201 = vmatpush.bf16.msra.mxu0 %v289_v2 }
  0x19   : > { %v173_v3 = vld [vmem:[#allocation2] sm:$0xf] }
  0x1b   : > { %286 = vmatmul.msk.bf16.vlgmr.msra.gmra.mxu0 %vm190_vm1, %v173_v3 }
  0x98   : > { %v203_v8 = vpop.f32.mrf.mxu0 }
  0x99   : > { %v211_v9 = vadd.f32 %v210_v7, %v203_v8 }
  0x9b   : > { %300 = vtanh.f32 %v211_v9 }
  0xa0   : > { %v205_v10 = vpop.f32.mrf.mxu0 }
  0xa1   : > { %v301_v11 = vpop.eup %300 }
  0xa2   : > { %v213_v12 = vpack.c.bf16 %v301_v11, %v301_v11 }
  0xa4   : > { %215 = vst.msk [vmem:[#allocation2] sm:$0xf] %vm214_vm2, %v213_v12 }
  0xa5   : > { %216 = vst.msk [vmem:[%s165_s21] sm:$0xf] %vm214_vm2, %v213_v12 }
  0xa6 PF: > { %s13_s12 = sadd.s32 1, %s308_s12  }
  0xa7   : > { %p10_p5 = scmp.ge.s32.totalorder %s13_s12, 10  }
  0xa9   :  { %12 = sbr.rel (!%p10_p5) target bundleno = 1 (0x1), region = 66 }

// kernel: captioning_forward.5
= control target key start
LH: loop header
LB: loop body
LE: loop exit
PB: predicated region body
PF: predicated region fallthrough
CT: control target
= control target key end

     0   :  { %vm86_vm0 = vcmask 261120   ;;  %vm21_vm1 = vcmask 7168   ;;  %v467_v6 = vmov -inf   ;;  %v468_v24 = vmov 0   ;;  %s740_s1 = inlined_call_operand.vmem [shape: bf16[32,128], index: 1, kind: input, shape index: {}]   ;;  %s741_s2 = inlined_call_operand.vmem [shape: f32[1,128], index: 2, kind: input, shape index: {}]   ;;  %s742_s0 = inlined_call_operand.vmem [shape: bf16[64,32], index: 0, kind: input, shape index: {}]   ;;  %s743_s3 = inlined_call_operand.vmem [shape: f32[64,128], index: 3, kind: output, shape index: {0}]   ;;  %s744_s4 = inlined_call_operand.vmem [shape: f32[64,1], index: 4, kind: output, shape index: {1}]  }
   0x1   :  { %v405_v0 = vld [vmem:[%s740_s1 + $0x8] sm:$0xff]  ;;  %v404_v1 = vld [vmem:[%s740_s1] sm:$0xff]  ;;  %v402_v4 = vld [vmem:[%s742_s0 + $0x10] sm:$0xff]  ;;  %24 = vst.msk [vmem:[#allocation2 + $0x10] sm:$0xff] %vm21_vm1, %v467_v6  ;;  %416 = vset.pattern.permute.xlu1 %v468_v24  ;;  %415 = vset.pattern.permute.xlu2 %v468_v24  ;;  %v469_v25 = vmov 0.0  }
   0x2   :  { %105 = vmatpush.bf16.msra.mxu0 %v405_v0  ;;  %406 = vmatpush.bf16.msra.mxu1 %v405_v0  ;;  %v400_v2 = vld [vmem:[%s742_s0] sm:$0xff]  ;;  %v401_v3 = vld [vmem:[%s742_s0 + $0x8] sm:$0xff]  ;;  %v403_v5 = vld [vmem:[%s742_s0 + $0x18] sm:$0xff]  ;;  %22 = vst.msk [vmem:[#allocation2] sm:$0xff] %vm21_vm1, %v467_v6 }
   0x3   :  { %407 = vmatpush.bf16.msra.mxu2 %v405_v0  ;;  %408 = vmatpush.bf16.msra.mxu3 %v405_v0  ;;  %23 = vst.msk [vmem:[#allocation2 + $0x8] sm:$0xff] %vm21_vm1, %v467_v6  ;;  %v418_v7 = vld [vmem:[%s741_s2] ss:$0 sm:$0xff] }
   0x4   :  { %25 = vst.msk [vmem:[#allocation2 + $0x18] sm:$0xff] %vm21_vm1, %v467_v6  ;;  %417 = vset.pattern.permute.xlu0 %v468_v24 }
   0x5   :  { %26 = vst.msk [vmem:[#allocation2 + $0x20] sm:$0xff] %vm21_vm1, %v467_v6 }
   0x6   :  { %106 = vmatpush.bf16.msra.mxu0 %v404_v1  ;;  %409 = vmatpush.bf16.msra.mxu1 %v404_v1  ;;  %27 = vst.msk [vmem:[#allocation2 + $0x28] sm:$0xff] %vm21_vm1, %v467_v6 }
   0x7   :  { %410 = vmatpush.bf16.msra.mxu2 %v404_v1  ;;  %411 = vmatpush.bf16.msra.mxu3 %v404_v1  ;;  %28 = vst.msk [vmem:[#allocation2 + $0x30] sm:$0xff] %vm21_vm1, %v467_v6 }
   0x8   :  { %29 = vst.msk [vmem:[#allocation2 + $0x38] sm:$0xff] %vm21_vm1, %v467_v6  ;;  %v588_v26 = vld [vmem:[#allocation2 + $0x10] sm:$0xff] }
   0x9   :  { %396 = vmatmul.msk.bf16.vlgmr.msra.gmra.mxu0 %vm86_vm0, %v400_v2  ;;  %397 = vmatmul.msk.bf16.vlgmr.msra.gmra.mxu1 %vm86_vm0, %v401_v3  ;;  %30 = vst.msk [vmem:[#allocation3] sm:$0xff] %vm21_vm1, %v469_v25  ;;  %v590_v27 = vld [vmem:[#allocation2] sm:$0xff] }
   0xa   :  { %398 = vmatmul.msk.bf16.vlgmr.msra.gmra.mxu2 %vm86_vm0, %v402_v4  ;;  %399 = vmatmul.msk.bf16.vlgmr.msra.gmra.mxu3 %vm86_vm0, %v403_v5  ;;  %31 = vst.msk [vmem:[#allocation3 + $0x8] sm:$0xff] %vm21_vm1, %v469_v25  ;;  %v640_v48 = vld [vmem:[#allocation2 + $0x8] sm:$0xff] }
   0xb   :  { %32 = vst.msk [vmem:[#allocation3 + $0x10] sm:$0xff] %vm21_vm1, %v469_v25  ;;  %v610_v35 = vld [vmem:[#allocation2 + $0x18] sm:$0xff] }
   0xc   :  { %33 = vst.msk [vmem:[#allocation3 + $0x18] sm:$0xff] %vm21_vm1, %v469_v25  ;;  %v608_v34 = vld [vmem:[#allocation2 + $0x20] sm:$0xff] }
   0xd   :  { %34 = vst.msk [vmem:[#allocation3 + $0x20] sm:$0xff] %vm21_vm1, %v469_v25  ;;  %v636_v46 = vld [vmem:[#allocation2 + $0x28] sm:$0xff] }
   0xe   :  { %35 = vst.msk [vmem:[#allocation3 + $0x28] sm:$0xff] %vm21_vm1, %v469_v25  ;;  %v612_v36 = vld [vmem:[#allocation2 + $0x30] sm:$0xff] }
   0xf   :  { %36 = vst.msk [vmem:[#allocation3 + $0x30] sm:$0xff] %vm21_vm1, %v469_v25  ;;  %v638_v47 = vld [vmem:[#allocation2 + $0x38] sm:$0xff] }
  0x10   :  { %37 = vst.msk [vmem:[#allocation3 + $0x38] sm:$0xff] %vm21_vm1, %v469_v25 }
  0x86   :  { %v108_v8 = vpop.f32.mrf.mxu0  ;;  %v113_v9 = vpop.f32.mrf.mxu1 }
  0x87   :  { %v524_v10 = vadd.f32 %v418_v7, %v108_v8  ;;  %v526_v11 = vadd.f32 %v418_v7, %v113_v9 }
  0x89   :  { %128 = vst [vmem:[%s743_s3] sm:$0xff] %v524_v10  ;;  %148 = vmax.xlane.f32.xlu1 %v526_v11  ;;  %144 = vmax.xlane.f32.xlu0 %v524_v10 }
  0x8a   :  { %130 = vst [vmem:[%s743_s3 + $0x10] sm:$0xff] %v526_v11 }
  0x8d   :  { %v118_v12 = vpop.f32.mrf.mxu2  ;;  %v123_v13 = vpop.f32.mrf.mxu3 }
  0x8e   :  { %v538_v14 = vadd.f32 %v418_v7, %v118_v12  ;;  %v540_v15 = vadd.f32 %v418_v7, %v123_v13  ;;  %v110_v16 = vpop.f32.mrf.mxu0  ;;  %v115_v17 = vpop.f32.mrf.mxu1 }
  0x8f   :  { %v542_v18 = vadd.f32 %v418_v7, %v110_v16  ;;  %v544_v19 = vadd.f32 %v418_v7, %v115_v17 }
  0x90   :  { %132 = vst [vmem:[%s743_s3 + $0x20] sm:$0xff] %v538_v14  ;;  %152 = vmax.xlane.f32.xlu2 %v538_v14 }
  0x91   :  { %134 = vst [vmem:[%s743_s3 + $0x30] sm:$0xff] %v540_v15  ;;  %150 = vmax.xlane.f32.xlu1 %v544_v19  ;;  %156 = vmax.xlane.f32.xlu0 %v540_v15 }
  0x92   :  { %129 = vst [vmem:[%s743_s3 + $0x8] sm:$0xff] %v542_v18 }
  0x93   :  { %131 = vst [vmem:[%s743_s3 + $0x18] sm:$0xff] %v544_v19 }
  0x95   :  { %v120_v20 = vpop.f32.mrf.mxu2  ;;  %v125_v21 = vpop.f32.mrf.mxu3 }
  0x96   :  { %v565_v22 = vadd.f32 %v418_v7, %v120_v20  ;;  %v567_v23 = vadd.f32 %v418_v7, %v125_v21 }
  0x98   :  { %133 = vst [vmem:[%s743_s3 + $0x28] sm:$0xff] %v565_v22  ;;  %154 = vmax.xlane.f32.xlu2 %v565_v22 }
  0x99   :  { %135 = vst [vmem:[%s743_s3 + $0x38] sm:$0xff] %v567_v23  ;;  %158 = vmax.xlane.f32.xlu1 %v567_v23  ;;  %146 = vmax.xlane.f32.xlu0 %v542_v18 }
  0xfc   :  { %v149_v28 = vpop.xlane.xlu1 %148  ;;  %v145_v29 = vpop.xlane.xlu0 %144 }
  0xfd   :  { %v593_v30 = vmax.f32 %v588_v26, %v149_v28  ;;  %v596_v31 = vmax.f32 %v590_v27, %v145_v29 }
  0xff   :  { %v178_v32 = vsub.f32 %v588_v26, %v593_v30  ;;  %307 = vst.msk [vmem:[#allocation2 + $0x10] sm:$0xff] %vm21_vm1, %v593_v30  ;;  %v176_v33 = vsub.f32 %v590_v27, %v596_v31  ;;  %220 = vperm.xlu1 %416, %v593_v30   ;;  %210 = vperm.xlu2 %415, %v596_v31  }
 0x100   :  { %305 = vst.msk [vmem:[#allocation2] sm:$0xff] %vm21_vm1, %v596_v31 }
 0x101   :  { %v188_v27 = vmul.f32 1.442695, %v178_v32 }
 0x103   :  { %v153_v37 = vpop.xlane.xlu2 %152 }
 0x104   :  { %v615_v38 = vmax.f32 %v608_v34, %v153_v37  ;;  %v151_v39 = vpop.xlane.xlu1 %150  ;;  %v157_v40 = vpop.xlane.xlu0 %156 }
 0x105   :  { %v618_v41 = vmax.f32 %v610_v35, %v151_v39  ;;  %v621_v42 = vmax.f32 %v612_v36, %v157_v40  ;;  %v168_v40 = vld [vmem:[#allocation3] sm:$0xff] }
 0x106   :  { %v180_v43 = vsub.f32 %v608_v34, %v615_v38  ;;  %309 = vst.msk [vmem:[#allocation2 + $0x20] sm:$0xff] %vm21_vm1, %v615_v38 }
 0x107   :  { %v179_v44 = vsub.f32 %v610_v35, %v618_v41  ;;  %308 = vst.msk [vmem:[#allocation2 + $0x18] sm:$0xff] %vm21_vm1, %v618_v41  ;;  %v182_v45 = vsub.f32 %v612_v36, %v621_v42  ;;  %230 = vperm.xlu2 %415, %v615_v38  }
 0x108   :  { %311 = vst.msk [vmem:[#allocation2 + $0x30] sm:$0xff] %vm21_vm1, %v621_v42  ;;  %v192_v37 = vmul.f32 1.442695, %v180_v43  ;;  %v316_v43 = vld [vmem:[#allocation2] sm:$0xff] }
 0x109   :  { %v196_v35 = vmul.f32 1.442695, %v182_v45 }
 0x10b   :  { %v155_v49 = vpop.xlane.xlu2 %154 }
 0x10c   :  { %v643_v50 = vmax.f32 %v636_v46, %v155_v49  ;;  %v159_v51 = vpop.xlane.xlu1 %158  ;;  %v147_v52 = vpop.xlane.xlu0 %146 }
 0x10d   :  { %v646_v53 = vmax.f32 %v638_v47, %v159_v51  ;;  %v649_v54 = vmax.f32 %v640_v48, %v147_v52 }
 0x10e   :  { %v181_v55 = vsub.f32 %v636_v46, %v643_v50  ;;  %310 = vst.msk [vmem:[#allocation2 + $0x28] sm:$0xff] %vm21_vm1, %v643_v50  ;;  %235 = vperm.xlu1 %416, %v643_v50  }
 0x10f   :  { %v183_v56 = vsub.f32 %v638_v47, %v646_v53  ;;  %312 = vst.msk [vmem:[#allocation2 + $0x38] sm:$0xff] %vm21_vm1, %v646_v53  ;;  %v177_v57 = vsub.f32 %v640_v48, %v649_v54  ;;  %225 = vperm.xlu2 %415, %v618_v41   ;;  %215 = vperm.xlu0 %417, %v649_v54   ;;  %v190_v48 = vmul.f32 1.442695, %v179_v44 }
 0x110   :  { %306 = vst.msk [vmem:[#allocation2 + $0x8] sm:$0xff] %vm21_vm1, %v649_v54 }
 0x111   :  { %v198_v46 = vmul.f32 1.442695, %v183_v56  ;;  %v175_v56 = vld [vmem:[#allocation3 + $0x38] sm:$0xff] }
 0x116   :  { %245 = vperm.xlu1 %416, %v646_v53   ;;  %v318_v53 = vld [vmem:[#allocation2 + $0x10] sm:$0xff] }
 0x117   :  { %240 = vperm.xlu2 %415, %v621_v42  }
 0x159   :  { %v211_v58 = vpop.permute.xlu2 %210 }
 0x15a   :  { %v248_v59 = vsub.f32 %v524_v10, %v211_v58  ;;  %v172_v58 = vld [vmem:[#allocation3 + $0x20] sm:$0xff] }
 0x15c   :  { %v256_v60 = vmul.f32 1.442695, %v248_v59 }
 0x15e   :  { %419 = vpow2.f32 %v256_v60 }
 0x161   :  { %v231_v61 = vpop.permute.xlu2 %230 }
 0x162   :  { %v252_v62 = vsub.f32 %v538_v14, %v231_v61 }
 0x164   :  { %v420_v63 = vpop.eup %419  ;;  %v264_v0 = vmul.f32 1.442695, %v252_v62 }
 0x165   :  { %272 = vadd.xlane.f32.xlu0 %v420_v63 }
 0x166   :  { %421 = vpow2.f32 %v264_v0  ;;  %v170_v0 = vld [vmem:[#allocation3 + $0x10] sm:$0xff] }
 0x169   :  { %v226_v7 = vpop.permute.xlu2 %225 }
 0x16a   :  { %v251_v14 = vsub.f32 %v544_v19, %v226_v7  ;;  %v169_v7 = vld [vmem:[#allocation3 + $0x8] sm:$0xff] }
 0x16c   :  { %v422_v1 = vpop.eup %421  ;;  %v262_v17 = vmul.f32 1.442695, %v251_v14 }
 0x16d   :  { %280 = vadd.xlane.f32.xlu0 %v422_v1  ;;  %v194_v1 = vmul.f32 1.442695, %v181_v55  ;;  %v173_v55 = vld [vmem:[#allocation3 + $0x28] sm:$0xff] }
 0x171   :  { %v221_v2 = vpop.permute.xlu1 %220  ;;  %v241_v21 = vpop.permute.xlu2 %240 }
 0x172   :  { %v250_v3 = vsub.f32 %v526_v11, %v221_v2 }
 0x174   :  { %v260_v4 = vmul.f32 1.442695, %v250_v3  ;;  %v186_v3 = vmul.f32 1.442695, %v177_v57 }
 0x176   :  { %423 = vpow2.f32 %v260_v4 }
 0x17c   :  { %v424_v5 = vpop.eup %423 }
 0x17d   :  { %276 = vadd.xlane.f32.xlu1 %v424_v5  ;;  %v320_v5 = vld [vmem:[#allocation2 + $0x20] sm:$0xff] }
 0x180   :  { %v236_v6 = vpop.permute.xlu1 %235 }
 0x181   :  { %v253_v8 = vsub.f32 %v565_v22, %v236_v6  ;;  %v216_v9 = vpop.permute.xlu0 %215 }
 0x182   :  { %v249_v10 = vsub.f32 %v542_v18, %v216_v9  ;;  %v254_v18 = vsub.f32 %v540_v15, %v241_v21 }
 0x183   :  { %v266_v12 = vmul.f32 1.442695, %v253_v8 }
 0x184   :  { %v258_v13 = vmul.f32 1.442695, %v249_v10  ;;  %v268_v22 = vmul.f32 1.442695, %v254_v18 }
 0x185   :  { %425 = vpow2.f32 %v266_v12 }
 0x186   :  { %427 = vpow2.f32 %v258_v13 }
 0x188   :  { %v246_v16 = vpop.permute.xlu1 %245 }
 0x189   :  { %v255_v11 = vsub.f32 %v567_v23, %v246_v16  ;;  %v184_v23 = vmul.f32 1.442695, %v176_v33 }
 0x18b   :  { %v426_v20 = vpop.eup %425  ;;  %v270_v24 = vmul.f32 1.442695, %v255_v11 }
 0x18c   :  { %v428_v25 = vpop.eup %427  ;;  %282 = vadd.xlane.f32.xlu1 %v426_v20 }
 0x18d   :  { %429 = vpow2.f32 %v270_v24  ;;  %274 = vadd.xlane.f32.xlu2 %v428_v25 }
 0x18e   :  { %431 = vpow2.f32 %v262_v17  ;;  %v171_v17 = vld [vmem:[#allocation3 + $0x18] sm:$0xff] }
 0x18f   :  { %433 = vpow2.f32 %v268_v22 }
 0x190   :  { %435 = vpow2.f32 %v184_v23 }
 0x191   :  { %437 = vpow2.f32 %v192_v37 }
 0x193   :  { %v430_v28 = vpop.eup %429 }
 0x194   :  { %v432_v29 = vpop.eup %431  ;;  %286 = vadd.xlane.f32.xlu0 %v430_v28  ;;  %v174_v28 = vld [vmem:[#allocation3 + $0x30] sm:$0xff] }
 0x195   :  { %278 = vadd.xlane.f32.xlu2 %v432_v29  ;;  %v434_v19 = vpop.eup %433 }
 0x196   :  { %v436_v39 = vpop.eup %435 }
 0x197   :  { %v200_v15 = vmul.f32 %v436_v39, %v168_v40  ;;  %v438_v52 = vpop.eup %437 }
 0x198   :  { %v204_v59 = vmul.f32 %v438_v52, %v172_v58  ;;  %v317_v58 = vld [vmem:[#allocation2 + $0x8] sm:$0xff] }
 0x19d   :  { %284 = vadd.xlane.f32.xlu2 %v434_v19 }
 0x1d8   :  { %v273_v49 = vpop.xlane.xlu0 %272 }
 0x1d9   :  { %v288_v51 = vadd.f32 %v273_v49, %v200_v15  ;;  %v321_v49 = vld [vmem:[#allocation2 + $0x28] sm:$0xff] }
 0x1db   :  { %297 = vst.msk [vmem:[#allocation3] sm:$0xff] %vm21_vm1, %v288_v51 }
 0x1e0   :  { %v281_v60 = vpop.xlane.xlu0 %280 }
 0x1e1   :  { %v292_v61 = vadd.f32 %v281_v60, %v204_v59 }
 0x1e2   :  { %v324_v31 = vld [vmem:[#allocation3] sm:$0xff] }
 0x1e3   :  { %439 = vlog2.f32 %v324_v31  ;;  %301 = vst.msk [vmem:[#allocation3 + $0x20] sm:$0xff] %vm21_vm1, %v292_v61 }
 0x1e4   :  { %441 = vpow2.f32 %v188_v27 }
 0x1e9   :  { %v440_v33 = vpop.eup %439 }
 0x1ea   :  { %v333_v34 = vmul.f32 0.6931472, %v440_v33  ;;  %v328_v38 = vld [vmem:[#allocation3 + $0x20] sm:$0xff]  ;;  %v442_v62 = vpop.eup %441  ;;  %v323_v33 = vld [vmem:[#allocation2 + $0x38] sm:$0xff] }
 0x1eb   :  { %443 = vlog2.f32 %v328_v38  ;;  %v202_v26 = vmul.f32 %v442_v62, %v170_v0 }
 0x1ec   :  { %v348_v63 = vadd.f32 %v333_v34, %v316_v43  ;;  %445 = vpow2.f32 %v194_v1  ;;  %v319_v43 = vld [vmem:[#allocation2 + $0x18] sm:$0xff] }
 0x1ed   :  { %447 = vpow2.f32 %v186_v3 }
 0x1ee   :  { %356 = vst.msk [vmem:[%s744_s4] sm:$0xff] %vm21_vm1, %v348_v63 }
 0x1f0   :  { %v277_v30 = vpop.xlane.xlu1 %276 }
 0x1f1   :  { %v444_v32 = vpop.eup %443  ;;  %v290_v2 = vadd.f32 %v277_v30, %v202_v26  ;;  %v322_v30 = vld [vmem:[#allocation2 + $0x30] sm:$0xff] }
 0x1f2   :  { %v341_v4 = vmul.f32 0.6931472, %v444_v32  ;;  %v446_v54 = vpop.eup %445 }
 0x1f3   :  { %299 = vst.msk [vmem:[#allocation3 + $0x10] sm:$0xff] %vm21_vm1, %v290_v2  ;;  %v448_v57 = vpop.eup %447  ;;  %v205_v8 = vmul.f32 %v446_v54, %v173_v55 }
 0x1f4   :  { %v352_v6 = vadd.f32 %v341_v4, %v320_v5  ;;  %v201_v10 = vmul.f32 %v448_v57, %v169_v7 }
 0x1f6   :  { %360 = vst.msk [vmem:[%s744_s4 + $0x20] sm:$0xff] %vm21_vm1, %v352_v6 }
 0x1fa   :  { %v326_v50 = vld [vmem:[#allocation3 + $0x10] sm:$0xff] }
 0x1fb   :  { %449 = vlog2.f32 %v326_v50 }
 0x1fc   :  { %451 = vpow2.f32 %v198_v46 }
 0x1fd   :  { %453 = vpow2.f32 %v190_v48 }
 0x1fe   :  { %455 = vpow2.f32 %v196_v35 }
 0x1ff   :  { %v283_v9 = vpop.xlane.xlu1 %282 }
 0x200   :  { %v293_v12 = vadd.f32 %v283_v9, %v205_v8  ;;  %v275_v13 = vpop.xlane.xlu2 %274 }
 0x201   :  { %v450_v14 = vpop.eup %449  ;;  %v289_v47 = vadd.f32 %v275_v13, %v201_v10 }
 0x202   :  { %v337_v41 = vmul.f32 0.6931472, %v450_v14  ;;  %302 = vst.msk [vmem:[#allocation3 + $0x28] sm:$0xff] %vm21_vm1, %v293_v12  ;;  %v452_v44 = vpop.eup %451 }
 0x203   :  { %298 = vst.msk [vmem:[#allocation3 + $0x8] sm:$0xff] %vm21_vm1, %v289_v47  ;;  %v454_v16 = vpop.eup %453  ;;  %v207_v20 = vmul.f32 %v452_v44, %v175_v56 }
 0x204   :  { %v350_v11 = vadd.f32 %v337_v41, %v318_v53  ;;  %v203_v42 = vmul.f32 %v454_v16, %v171_v17  ;;  %v456_v22 = vpop.eup %455 }
 0x205   :  { %v206_v29 = vmul.f32 %v456_v22, %v174_v28 }
 0x206   :  { %358 = vst.msk [vmem:[%s744_s4 + $0x10] sm:$0xff] %vm21_vm1, %v350_v11 }
 0x207   :  { %v287_v36 = vpop.xlane.xlu0 %286 }
 0x208   :  { %v295_v45 = vadd.f32 %v287_v36, %v207_v20  ;;  %v279_v21 = vpop.xlane.xlu2 %278 }
 0x209   :  { %v329_v24 = vld [vmem:[#allocation3 + $0x28] sm:$0xff]  ;;  %v291_v25 = vadd.f32 %v279_v21, %v203_v42 }
 0x20a   :  { %457 = vlog2.f32 %v329_v24  ;;  %v325_v18 = vld [vmem:[#allocation3 + $0x8] sm:$0xff]  ;;  %304 = vst.msk [vmem:[#allocation3 + $0x38] sm:$0xff] %vm21_vm1, %v295_v45 }
 0x20b   :  { %459 = vlog2.f32 %v325_v18  ;;  %300 = vst.msk [vmem:[#allocation3 + $0x18] sm:$0xff] %vm21_vm1, %v291_v25 }
 0x210   :  { %v458_v19 = vpop.eup %457  ;;  %v285_v23 = vpop.xlane.xlu2 %284 }
 0x211   :  { %v460_v37 = vpop.eup %459  ;;  %v343_v39 = vmul.f32 0.6931472, %v458_v19  ;;  %v331_v40 = vld [vmem:[#allocation3 + $0x38] sm:$0xff]  ;;  %v294_v15 = vadd.f32 %v285_v23, %v206_v29 }
 0x212   :  { %v335_v51 = vmul.f32 0.6931472, %v460_v37  ;;  %461 = vlog2.f32 %v331_v40  ;;  %v327_v52 = vld [vmem:[#allocation3 + $0x18] sm:$0xff] }
 0x213   :  { %v353_v59 = vadd.f32 %v343_v39, %v321_v49  ;;  %463 = vlog2.f32 %v327_v52  ;;  %303 = vst.msk [vmem:[#allocation3 + $0x30] sm:$0xff] %vm21_vm1, %v294_v15 }
 0x214   :  { %v349_v60 = vadd.f32 %v335_v51, %v317_v58 }
 0x215   :  { %361 = vst.msk [vmem:[%s744_s4 + $0x28] sm:$0xff] %vm21_vm1, %v353_v59 }
 0x216   :  { %357 = vst.msk [vmem:[%s744_s4 + $0x8] sm:$0xff] %vm21_vm1, %v349_v60 }
 0x218   :  { %v462_v61 = vpop.eup %461 }
 0x219   :  { %v464_v27 = vpop.eup %463  ;;  %v347_v31 = vmul.f32 0.6931472, %v462_v61 }
 0x21a   :  { %v339_v34 = vmul.f32 0.6931472, %v464_v27  ;;  %v330_v38 = vld [vmem:[#allocation3 + $0x30] sm:$0xff] }
 0x21b   :  { %v355_v62 = vadd.f32 %v347_v31, %v323_v33  ;;  %465 = vlog2.f32 %v330_v38 }
 0x21c   :  { %v351_v63 = vadd.f32 %v339_v34, %v319_v43 }
 0x21d   :  { %363 = vst.msk [vmem:[%s744_s4 + $0x38] sm:$0xff] %vm21_vm1, %v355_v62 }
 0x21e   :  { %359 = vst.msk [vmem:[%s744_s4 + $0x18] sm:$0xff] %vm21_vm1, %v351_v63 }
 0x221   :  { %v466_v0 = vpop.eup %465 }
 0x222   :  { %v345_v26 = vmul.f32 0.6931472, %v466_v0 }
 0x224   :  { %v354_v32 = vadd.f32 %v345_v26, %v322_v30 }
 0x226   :  { %362 = vst.msk [vmem:[%s744_s4 + $0x30] sm:$0xff] %vm21_vm1, %v354_v32 }

</bundles_post_ra>
